<compile_context>
chip_gen: v6e
topology: v6e:2x2x1
jax: 0.10.0
libtpu: 0.0.40
codegen_flags: <defaults>
</compile_context>

<pallas_src>
import functools

import jax
import jax.numpy as jnp
from jax.experimental import pallas as pl
from jax.experimental.pallas import tpu as pltpu


def _round_up(x, m):
    return ((x + m - 1) // m) * m


def ada_emb_cls_kernel(idx_ref, folded_ref, b0_ref, g_ref, beta_ref,
                       w1_ref, b1_ref, out_ref, *, eps):
    block_n = idx_ref.shape[0]
    num_classes = folded_ref.shape[0]

    # ---- Embedding lookup + l0, folded:  h = one_hot @ (table @ W0) + b0.
    # one_hot values are exactly 0/1; folded is f32 and only (C, D), so h is exact f32.
    idx = idx_ref[...]                                                    # (block_n, 1) int32
    classes = jax.lax.broadcasted_iota(jnp.int32, (block_n, num_classes), 1)
    one_hot = (classes == idx).astype(jnp.float32)                        # (block_n, C)
    h = jnp.dot(one_hot, folded_ref[...],
                preferred_element_type=jnp.float32) + b0_ref[...]         # (block_n, D) f32

    # ---- LayerNorm over the feature (lane) axis, f32 on the VPU.
    mean = jnp.mean(h, axis=-1, keepdims=True)
    xc = h - mean
    var = jnp.mean(xc * xc, axis=-1, keepdims=True)
    hn = xc * jax.lax.rsqrt(var + eps) * g_ref[...] + beta_ref[...]

    # ---- SiLU: x * sigmoid(x) — single EUP logistic.
    s = hn * jax.nn.sigmoid(hn)

    # ---- final Linear: bf16 MXU operands, f32 accumulation.
    out = jnp.dot(s.astype(jnp.bfloat16), w1_ref[...],
                  preferred_element_type=jnp.float32) + b1_ref[...]
    out_ref[...] = out.astype(out_ref.dtype)


def _choose_block_n(n):
    """Row tile: big tiles to amortize per-step overhead, but >=2 grid steps when
    there is enough work so v7x megacore can shard the batch axis."""
    block_n = min(512, _round_up(max(n, 1), 8))
    if n > 8 and (_round_up(n, block_n) // block_n) < 2:
        block_n = max(8, _round_up(pl.cdiv(n, 2), 8))
    return block_n


def ada_emb_cls(timestep, emb_table, w0, b0, ln_gamma, ln_beta, w1, b1, *, eps=1e-5):
    """Pallas forward of AdaEMB_Cls.

    timestep:  (N,) int32 class indices
    emb_table: (num_classes, n_embd)
    w0, w1:    (n_embd, n_embd)  — already transposed vs. PyTorch Linear.weight (y = x @ W + b)
    b0, b1, ln_gamma, ln_beta: (n_embd,)
    Returns (N, 1, n_embd) float32  (matching PyTorch's .unsqueeze(1)).
    """
    n = timestep.shape[0]
    num_classes, n_embd = emb_table.shape

    block_n = _choose_block_n(n)
    n_pad = _round_up(n, block_n)
    grid = (n_pad // block_n,)

    # Pad indices with class 0 (rows discarded after the call).
    idx = jnp.zeros((n_pad, 1), jnp.int32).at[:n, 0].set(timestep.astype(jnp.int32))

    # Exact algebraic fold of the embedding table through l0 (f32, done once).
    folded = emb_table.astype(jnp.float32) @ w0.astype(jnp.float32)       # (C, D) f32
    w1_bf = w1.astype(jnp.bfloat16)
    b0_2d = b0.reshape(1, n_embd).astype(jnp.float32)
    b1_2d = b1.reshape(1, n_embd).astype(jnp.float32)
    g_2d = ln_gamma.reshape(1, n_embd).astype(jnp.float32)
    be_2d = ln_beta.reshape(1, n_embd).astype(jnp.float32)

    const2d = lambda i: (0, 0)   # weights: same block every step -> VMEM-resident
    row_map = lambda i: (i, 0)   # batch-streamed arrays

    # Deliberate scoped-VMEM budget (double buffering accounted for), v7x-safe cap.
    bytes_const = (num_classes * n_embd * 4     # folded table (f32)
                   + n_embd * n_embd * 2        # W1 (bf16)
                   + 4 * n_embd * 4)            # b0, b1, gamma, beta (f32)
    bytes_stream = block_n * 4 + block_n * n_embd * 4   # idx in + out f32 per buffer
    vmem_needed = 2 * (bytes_const + bytes_stream)
    vmem_limit = int(min(64 * 1024 * 1024, max(4 * vmem_needed, 16 * 1024 * 1024)))

    out = pl.pallas_call(
        functools.partial(ada_emb_cls_kernel, eps=eps),
        out_shape=jax.ShapeDtypeStruct((n_pad, n_embd), jnp.float32),
        grid_spec=pltpu.PrefetchScalarGridSpec(
            num_scalar_prefetch=0,
            grid=grid,
            in_specs=[
                pl.BlockSpec((block_n, 1), row_map),             # class indices
                pl.BlockSpec((num_classes, n_embd), const2d),    # folded = table @ W0 (f32)
                pl.BlockSpec((1, n_embd), const2d),              # b0
                pl.BlockSpec((1, n_embd), const2d),              # LN gamma
                pl.BlockSpec((1, n_embd), const2d),              # LN beta
                pl.BlockSpec((n_embd, n_embd), const2d),         # W1 (bf16)
                pl.BlockSpec((1, n_embd), const2d),              # b1
            ],
            out_specs=pl.BlockSpec((block_n, n_embd), row_map),
        ),
        compiler_params=pltpu.CompilerParams(
            dimension_semantics=("parallel",),
            vmem_limit_bytes=vmem_limit),
    )(idx, folded, b0_2d, g_2d, be_2d, w1_bf, b1_2d)

    return out[:n][:, None, :]   # unsqueeze(1)


def reference_forward(timestep, emb_table, w0, b0, gamma, beta, w1, b1, eps=1e-5):
    """Pure-JAX f32 reference matching the PyTorch module semantics."""
    x = emb_table[timestep]
    h = x @ w0 + b0
    mean = h.mean(-1, keepdims=True)
    var = ((h - mean) ** 2).mean(-1, keepdims=True)
    hn = (h - mean) / jnp.sqrt(var + eps) * gamma + beta
    s = hn * jax.nn.sigmoid(hn)
    out = s @ w1 + b1
    return out[:, None, :]


if __name__ == "__main__":
    n_embd = 128        # lane-aligned hidden size
    num_classes = 16    # small class vocabulary
    key = jax.random.PRNGKey(0)
    kt, ke, k0, kb0, kg, kbe, k1, kb1 = jax.random.split(key, 8)

    emb_table = jax.random.normal(ke, (num_classes, n_embd), jnp.float32)
    w0 = jax.random.normal(k0, (n_embd, n_embd), jnp.float32) * 0.02
    b0 = jax.random.normal(kb0, (n_embd,), jnp.float32) * 0.02
    ln_gamma = 1.0 + 0.1 * jax.random.normal(kg, (n_embd,), jnp.float32)
    ln_beta = 0.1 * jax.random.normal(kbe, (n_embd,), jnp.float32)
    w1 = jax.random.normal(k1, (n_embd, n_embd), jnp.float32) * 0.02
    b1 = jax.random.normal(kb1, (n_embd,), jnp.float32) * 0.02

    # Case 1: tiny batch (single 8-row tile, exercises padding N=5 -> 8).
    n = 5
    timestep = jax.random.randint(kt, (n,), 0, num_classes, dtype=jnp.int32)
    out = jax.block_until_ready(
        ada_emb_cls(timestep, emb_table, w0, b0, ln_gamma, ln_beta, w1, b1))
    ref = reference_forward(timestep, emb_table, w0, b0, ln_gamma, ln_beta, w1, b1)
    assert out.shape == (n, 1, n_embd), out.shape
    err = float(jnp.max(jnp.abs(out - ref)))
    assert jnp.allclose(out, ref, rtol=2e-2, atol=2e-2), f"tiny-batch mismatch (max abs err {err})"

    # Case 2: slightly larger batch (forces >= 2 grid steps: block_n=16, n_pad=32).
    n2 = 20
    timestep2 = jax.random.randint(jax.random.PRNGKey(1), (n2,), 0, num_classes, dtype=jnp.int32)
    out2 = jax.block_until_ready(
        ada_emb_cls(timestep2, emb_table, w0, b0, ln_gamma, ln_beta, w1, b1))
    ref2 = reference_forward(timestep2, emb_table, w0, b0, ln_gamma, ln_beta, w1, b1)
    assert out2.shape == (n2, 1, n_embd), out2.shape
    err2 = float(jnp.max(jnp.abs(out2 - ref2)))
    assert jnp.allclose(out2, ref2, rtol=2e-2, atol=2e-2), f"multi-tile mismatch (max abs err {err2})"

    print("KERNEL_OK")
</pallas_src>

<mosaic_0001>
module attributes {stable_mosaic.version = 11 : i64} {
  func.func @ada_emb_cls_kernel(%arg0: i32, %arg1: memref<8x1xi32, #tpu.memory_space<vmem>>, %arg2: memref<16x128xf32, #tpu.memory_space<vmem>>, %arg3: memref<1x128xf32, #tpu.memory_space<vmem>>, %arg4: memref<1x128xf32, #tpu.memory_space<vmem>>, %arg5: memref<1x128xf32, #tpu.memory_space<vmem>>, %arg6: memref<128x128xbf16, #tpu.memory_space<vmem>>, %arg7: memref<1x128xf32, #tpu.memory_space<vmem>>, %arg8: memref<8x128xf32, #tpu.memory_space<vmem>>) attributes {dimension_semantics = [#tpu.dimension_semantics<parallel>], iteration_bounds = array<i64: 1>, scalar_prefetch = 0 : i64, scratch_operands = 0 : i64, tpu.core_type = #tpu.core_type<tc>, window_params = [{transform_indices = @transform_0, window_bounds = array<i64: 8, 1>}, {pipeline_mode = #tpu.pipeline_mode<synchronous>, transform_indices = @transform_1, window_bounds = array<i64: 16, 128>}, {pipeline_mode = #tpu.pipeline_mode<synchronous>, transform_indices = @transform_2, window_bounds = array<i64: 1, 128>}, {pipeline_mode = #tpu.pipeline_mode<synchronous>, transform_indices = @transform_3, window_bounds = array<i64: 1, 128>}, {pipeline_mode = #tpu.pipeline_mode<synchronous>, transform_indices = @transform_4, window_bounds = array<i64: 1, 128>}, {pipeline_mode = #tpu.pipeline_mode<synchronous>, transform_indices = @transform_5, window_bounds = array<i64: 128, 128>}, {pipeline_mode = #tpu.pipeline_mode<synchronous>, transform_indices = @transform_6, window_bounds = array<i64: 1, 128>}, {transform_indices = @transform_7, window_bounds = array<i64: 8, 128>}]} {
    %c0 = arith.constant 0 : index
    %c0_0 = arith.constant 0 : index
    %0 = vector.load %arg1[%c0, %c0_0] : memref<8x1xi32, #tpu.memory_space<vmem>>, vector<8x1xi32>
    %1 = tpu.iota {dimensions = array<i32: 1>} : vector<8x16xi32>
    %2 = vector.broadcast %0 : vector<8x1xi32> to vector<8x16xi32>
    %3 = arith.cmpi eq, %1, %2 : vector<8x16xi32>
    %4 = arith.extui %3 : vector<8x16xi1> to vector<8x16xi32>
    %5 = arith.sitofp %4 : vector<8x16xi32> to vector<8x16xf32>
    %c0_1 = arith.constant 0 : index
    %c0_2 = arith.constant 0 : index
    %6 = vector.load %arg2[%c0_1, %c0_2] : memref<16x128xf32, #tpu.memory_space<vmem>>, vector<16x128xf32>
    %cst = arith.constant dense<0.000000e+00> : vector<8x128xf32>
    %7 = tpu.matmul %5, %6, %cst {dimension_numbers = #tpu.dot_dimension_numbers<[1], [0], [0], [1], [0, 0, 1, 1], [], []>} : vector<8x16xf32>, vector<16x128xf32>, vector<8x128xf32> -> vector<8x128xf32>
    %c0_3 = arith.constant 0 : index
    %c0_4 = arith.constant 0 : index
    %8 = vector.load %arg3[%c0_3, %c0_4] : memref<1x128xf32, #tpu.memory_space<vmem>>, vector<1x128xf32>
    %9 = vector.broadcast %8 : vector<1x128xf32> to vector<8x128xf32>
    %10 = arith.addf %7, %9 : vector<8x128xf32>
    %cst_5 = arith.constant dense<0.000000e+00> : vector<8xf32>
    %11 = vector.multi_reduction <add>, %10, %cst_5 [1] : vector<8x128xf32> to vector<8xf32>
    %12 = vector.shape_cast %11 : vector<8xf32> to vector<8x1xf32>
    %cst_6 = arith.constant 1.280000e+02 : f32
    %13 = vector.broadcast %cst_6 : f32 to vector<8x1xf32>
    %14 = arith.divf %12, %13 : vector<8x1xf32>
    %15 = vector.broadcast %14 : vector<8x1xf32> to vector<8x128xf32>
    %16 = arith.subf %10, %15 : vector<8x128xf32>
    %17 = arith.mulf %16, %16 : vector<8x128xf32>
    %cst_7 = arith.constant dense<0.000000e+00> : vector<8xf32>
    %18 = vector.multi_reduction <add>, %17, %cst_7 [1] : vector<8x128xf32> to vector<8xf32>
    %19 = vector.shape_cast %18 : vector<8xf32> to vector<8x1xf32>
    %cst_8 = arith.constant 1.280000e+02 : f32
    %20 = vector.broadcast %cst_8 : f32 to vector<8x1xf32>
    %21 = arith.divf %19, %20 : vector<8x1xf32>
    %cst_9 = arith.constant 9.99999974E-6 : f32
    %22 = vector.broadcast %cst_9 : f32 to vector<8x1xf32>
    %23 = arith.addf %21, %22 : vector<8x1xf32>
    %24 = math.rsqrt %23 : vector<8x1xf32>
    %25 = vector.broadcast %24 : vector<8x1xf32> to vector<8x128xf32>
    %26 = arith.mulf %16, %25 : vector<8x128xf32>
    %c0_10 = arith.constant 0 : index
    %c0_11 = arith.constant 0 : index
    %27 = vector.load %arg4[%c0_10, %c0_11] : memref<1x128xf32, #tpu.memory_space<vmem>>, vector<1x128xf32>
    %28 = vector.broadcast %27 : vector<1x128xf32> to vector<8x128xf32>
    %29 = arith.mulf %26, %28 : vector<8x128xf32>
    %c0_12 = arith.constant 0 : index
    %c0_13 = arith.constant 0 : index
    %30 = vector.load %arg5[%c0_12, %c0_13] : memref<1x128xf32, #tpu.memory_space<vmem>>, vector<1x128xf32>
    %31 = vector.broadcast %30 : vector<1x128xf32> to vector<8x128xf32>
    %32 = arith.addf %29, %31 : vector<8x128xf32>
    %33 = arith.negf %32 : vector<8x128xf32>
    %34 = math.exp %33 : vector<8x128xf32>
    %cst_14 = arith.constant 1.000000e+00 : f32
    %35 = vector.broadcast %cst_14 : f32 to vector<8x128xf32>
    %36 = arith.addf %35, %34 : vector<8x128xf32>
    %37 = arith.divf %35, %36 : vector<8x128xf32>
    %38 = arith.mulf %32, %37 : vector<8x128xf32>
    %39 = arith.truncf %38 : vector<8x128xf32> to vector<8x128xbf16>
    %c0_15 = arith.constant 0 : index
    %c0_16 = arith.constant 0 : index
    %40 = vector.load %arg6[%c0_15, %c0_16] : memref<128x128xbf16, #tpu.memory_space<vmem>>, vector<128x128xbf16>
    %cst_17 = arith.constant dense<0.000000e+00> : vector<8x128xf32>
    %41 = tpu.matmul %39, %40, %cst_17 {dimension_numbers = #tpu.dot_dimension_numbers<[1], [0], [0], [1], [0, 0, 1, 1], [], []>} : vector<8x128xbf16>, vector<128x128xbf16>, vector<8x128xf32> -> vector<8x128xf32>
    %c0_18 = arith.constant 0 : index
    %c0_19 = arith.constant 0 : index
    %42 = vector.load %arg7[%c0_18, %c0_19] : memref<1x128xf32, #tpu.memory_space<vmem>>, vector<1x128xf32>
    %43 = vector.broadcast %42 : vector<1x128xf32> to vector<8x128xf32>
    %44 = arith.addf %41, %43 : vector<8x128xf32>
    %c0_20 = arith.constant 0 : index
    %c0_21 = arith.constant 0 : index
    %45 = vector.load %arg8[%c0_20, %c0_21] : memref<8x128xf32, #tpu.memory_space<vmem>>, vector<8x128xf32>
    tpu.vector_store %arg8[%c0_20, %c0_21], %44 {strides = array<i32>} : memref<8x128xf32, #tpu.memory_space<vmem>>, vector<8x128xf32>,
    return
  }
  func.func @transform_0(%arg0: i32) -> (i32, i32) {
    %c0_i32 = arith.constant 0 : i32
    %c0_i32_0 = arith.constant 0 : i32
    return %arg0, %c0_i32 : i32, i32
  }
  func.func @transform_1(%arg0: i32) -> (i32, i32) {
    %c0_i32 = arith.constant 0 : i32
    %c0_i32_0 = arith.constant 0 : i32
    %c0_i32_1 = arith.constant 0 : i32
    return %c0_i32, %c0_i32_0 : i32, i32
  }
  func.func @transform_2(%arg0: i32) -> (i32, i32) {
    %c0_i32 = arith.constant 0 : i32
    %c0_i32_0 = arith.constant 0 : i32
    %c0_i32_1 = arith.constant 0 : i32
    return %c0_i32, %c0_i32_0 : i32, i32
  }
  func.func @transform_3(%arg0: i32) -> (i32, i32) {
    %c0_i32 = arith.constant 0 : i32
    %c0_i32_0 = arith.constant 0 : i32
    %c0_i32_1 = arith.constant 0 : i32
    return %c0_i32, %c0_i32_0 : i32, i32
  }
  func.func @transform_4(%arg0: i32) -> (i32, i32) {
    %c0_i32 = arith.constant 0 : i32
    %c0_i32_0 = arith.constant 0 : i32
    %c0_i32_1 = arith.constant 0 : i32
    return %c0_i32, %c0_i32_0 : i32, i32
  }
  func.func @transform_5(%arg0: i32) -> (i32, i32) {
    %c0_i32 = arith.constant 0 : i32
    %c0_i32_0 = arith.constant 0 : i32
    %c0_i32_1 = arith.constant 0 : i32
    return %c0_i32, %c0_i32_0 : i32, i32
  }
  func.func @transform_6(%arg0: i32) -> (i32, i32) {
    %c0_i32 = arith.constant 0 : i32
    %c0_i32_0 = arith.constant 0 : i32
    %c0_i32_1 = arith.constant 0 : i32
    return %c0_i32, %c0_i32_0 : i32, i32
  }
  func.func @transform_7(%arg0: i32) -> (i32, i32) {
    %c0_i32 = arith.constant 0 : i32
    %c0_i32_0 = arith.constant 0 : i32
    return %arg0, %c0_i32 : i32, i32
  }
}

</mosaic_0001>

<bundles_post_ra>
// kernel: tpu_custom_call.1
= control target key start
LH: loop header
LB: loop body
LE: loop exit
PB: predicated region body
PF: predicated region fallthrough
CT: control target
= control target key end

     0   :  { %12 = vsyncpa [#allocation3], 0  ;;  %s531_s0 = inlined_call_operand.vmem [shape: s32[8,1], index: 0, kind: input, shape index: {}]   ;;  %s532_s1 = inlined_call_operand.hbm [shape: f32[16,128], index: 1, kind: input, shape index: {}]   ;;  %s533_s2 = inlined_call_operand.vmem [shape: f32[1,128], index: 2, kind: input, shape index: {}]   ;;  %s534_s3 = inlined_call_operand.vmem [shape: f32[1,128], index: 3, kind: input, shape index: {}]   ;;  %s535_s4 = inlined_call_operand.vmem [shape: f32[1,128], index: 4, kind: input, shape index: {}]   ;;  %s536_s5 = inlined_call_operand.hbm [shape: bf16[128,128], index: 5, kind: input, shape index: {}]   ;;  %s537_s6 = inlined_call_operand.vmem [shape: f32[1,128], index: 6, kind: input, shape index: {}]   ;;  %s538_s7 = inlined_call_operand.hbm [shape: f32[8,128], index: 7, kind: output, shape index: {}]  }
   0x1   :  { %13 = vsyncpa [#allocation6], 0 }
   0x2   :  { %14 = vsyncpa [#allocation4], 0  ;;  %s457_s24 = smov [#allocation2]  }
   0x3   :  { %s22_s25 = sshll.u32 %s457_s24, 4  ;;  %s23_s25 = int_to_ptr.vmem [resolvable:$true] %s22_s25 }
   0x4   :  { %s399_s26 = scalar_lea.vmem %s23_s25, 256  ;;  %p404_p1 = scmp.lt.s32.totalorder %s23_s25, %s23_s25 }
   0x5   :  { %p400_p0 = scmp.ne.s32.totalorder %s23_s25, %s399_s26  ;;  %p405_p2 = scmp.lt.s32.totalorder %s399_s26, %s399_s26 }
   0x7   :  { %p406_p3 = por %p405_p2, %p404_p1 }
   0x9   :  { %p407_p4 = pnand %p406_p3, %p400_p0 }
   0xb   :  { %410 = shalt.err (!%p407_p4)
}
   0xc   :  { %s458_s27 = smov 128   ;;  %s459_s28 = smov 8  }
   0xd   :  { %28 = dma.hbm_to_vmem [thread:$0]  %s532_s1, 256, %s23_s25, [#allocation3], %s458_s27, %s458_s27, %s459_s28  }
   0xe   :  { %s460_s8 = smov [#allocation5]  }
   0xf   :  { %s40_s9 = sshll.u32 %s460_s8, 4  ;;  %s41_s9 = int_to_ptr.vmem [resolvable:$true] %s40_s9 }
  0x10   :  { %s419_s10 = scalar_lea.vmem %s41_s9, 1024  ;;  %p424_p6 = scmp.lt.s32.totalorder %s41_s9, %s41_s9 }
  0x11   :  { %p420_p5 = scmp.ne.s32.totalorder %s41_s9, %s419_s10  ;;  %p425_p7 = scmp.lt.s32.totalorder %s419_s10, %s419_s10 }
  0x13   :  { %p426_p8 = por %p425_p7, %p424_p6 }
  0x15   :  { %p427_p9 = pnand %p426_p8, %p420_p5 }
  0x17   :  { %430 = shalt.err (!%p427_p9)
}
  0x18   :  { %s461_s11 = smov 64   ;;  %s462_s12 = smov 4  }
  0x19   :  { %46 = dma.hbm_to_vmem [thread:$0]  %s536_s5, 1024, %s41_s9, [#allocation6], %s461_s11, %s461_s11, %s462_s12  }
  0x1a   :  { %451 = dma.done.wait [#allocation3], 256  }
  0x1b   :  { %452 = vsyncadd [#allocation3], 4294967040 }
  0x1c   :  { %453 = dma.done.wait [#allocation6], 1024  }
  0x1d   :  { %454 = vsyncadd [#allocation6], 4294966272  ;;  %v463_v0 = vmov 0   ;;  %v464_v1 = vmov 0.0   ;;  %vm465_vm0 = vmmov 0   ;;  %v56_v2 = vld [vmem:[%s531_s0] sm:$0xff]  ;;  %v57_v5 = vlaneseq }
  0x1e   :  { %376 = vset.pattern.permute.xlu0 %v463_v0  ;;  %339 = vmatprep.subr.mxu0 %v464_v1  ;;  %v66_v3 = vld [vmem:[#allocation2 + $0x8] sm:$0xff]  ;;  %v65_v4 = vld [vmem:[#allocation2] sm:$0xff]  ;;  %vm74_vm1 = vcmask 130048   ;;  %v379_v19 = vld [vmem:[#allocation5 + $0x28] sm:$0xff]  }
  0x1f   :  { %346 = vmatprep.subr.bf16.mxu1 %v464_v1  ;;  %343 = vmatprep.mubr.msk.f32.mxu0 %vm465_vm0, %v464_v1  ;;  %v58_v6 = vand.u32 127, %v57_v5  ;;  %v313_v9 = vld [vmem:[%s533_s2] ss:$0 sm:$0xff]  ;;  %v377_v17 = vld [vmem:[#allocation5 + $0x38] sm:$0xff]   ;;  %v380_v20 = vld [vmem:[#allocation5 + $0x20] sm:$0xff]  }
  0x20   :  { %362 = vmatprep.mubr.msk.bf16.mxu1 %vm465_vm0, %v464_v1  ;;  %60 = vperm.xlu0 %376, %v56_v2   ;;  %v378_v18 = vld [vmem:[#allocation5 + $0x30] sm:$0xff]   ;;  %v381_v21 = vld [vmem:[#allocation5 + $0x18] sm:$0xff]   ;;  %v383_v23 = vld [vmem:[#allocation5 + $0x8] sm:$0xff]  }
  0x21   :  { %340 = vmatpush3.msra.mxu0 %v66_v3  ;;  %347 = vmatpush3.bf16.msra.mxu1 %v377_v17  ;;  %v382_v22 = vld [vmem:[#allocation5 + $0x10] sm:$0xff]   ;;  %v384_v24 = vld [vmem:[#allocation5] sm:$0xff]  }
  0x22   :  { %341 = vmatprep.subr.mxu0 %v464_v1  ;;  %348 = vmatprep.subr.bf16.mxu1 %v464_v1  ;;  %v315_v29 = vld [vmem:[%s534_s3] ss:$0 sm:$0xff]  ;;  %s466_s3 = smov [#allocation7]  }
  0x23   :  { %342 = vmatpush3.msra.mxu0 %v65_v4  ;;  %v316_v31 = vld [vmem:[%s535_s4] ss:$0 sm:$0xff]  ;;  %s302_s21 = sshll.u32 %s466_s3, 4  ;;  %s303_s21 = int_to_ptr.vmem [resolvable:$true] %s302_s21 }
  0x24   :  { %v318_v40 = vld [vmem:[%s537_s6] ss:$0 sm:$0xff]  ;;  %s431_s4 = scalar_lea.vmem %s303_s21, 128  ;;  %p436_p11 = scmp.lt.s32.totalorder %s303_s21, %s303_s21 }
  0x25   :  { %349 = vmatpush3.bf16.msra.mxu1 %v378_v18  ;;  %p432_p10 = scmp.ne.s32.totalorder %s303_s21, %s431_s4  ;;  %p437_p12 = scmp.lt.s32.totalorder %s431_s4, %s431_s4 }
  0x26   :  { %350 = vmatprep.subr.bf16.mxu1 %v464_v1 }
  0x27   :  { %p438_p13 = por %p437_p12, %p436_p11 }
  0x29   :  { %351 = vmatpush3.bf16.msra.mxu1 %v379_v19  ;;  %p439_p0 = pnand %p438_p13, %p432_p10 }
  0x2a   :  { %352 = vmatprep.subr.bf16.mxu1 %v464_v1 }
  0x2d   :  { %353 = vmatpush3.bf16.msra.mxu1 %v380_v20 }
  0x2e   :  { %354 = vmatprep.subr.bf16.mxu1 %v464_v1 }
  0x31   :  { %355 = vmatpush3.bf16.msra.mxu1 %v381_v21 }
  0x32   :  { %356 = vmatprep.subr.bf16.mxu1 %v464_v1 }
  0x35   :  { %357 = vmatpush3.bf16.msra.mxu1 %v382_v22 }
  0x36   :  { %358 = vmatprep.subr.bf16.mxu1 %v464_v1 }
  0x39   :  { %359 = vmatpush3.bf16.msra.mxu1 %v383_v23 }
  0x3a   :  { %360 = vmatprep.subr.bf16.mxu1 %v464_v1 }
  0x3d   :  { %361 = vmatpush3.bf16.msra.mxu1 %v384_v24 }
  0x9b   :  { %v61_v7 = vpop.permute.xlu0 %60 }
  0x9c   :  { %vm62_vm2 = vcmp.eq.s32.totalorder %v58_v6, %v61_v7 }
  0x9d   :  { %v312_v8 = vsel %vm62_vm2, 1.0, %v464_v1 }
  0x9e   :  { %344 = vmatmul.mubr.msk.f32.vlgmr.msra.gmra.mxu0 %vm74_vm1, %v312_v8 }
 0x15e   :  { %v144_v10 = vpop.f32.mrf.mxu0 }
 0x15f   :  { %v145_v11 = vadd.f32 %v313_v9, %v144_v10 }
 0x160   :  { %v345_v12 = vpop.f32.mrf.mxu0 }
 0x161   :  { %148 = vadd.xlane.f32.xlu0 %v145_v11 }
 0x1ea   :  { %v149_v13 = vpop.xlane.xlu0 %148 }
 0x1eb   :  { %v151_v14 = vmul.f32 0.0078125, %v149_v13 }
 0x1ed   :  { %v152_v15 = vsub.f32 %v145_v11, %v151_v14 }
 0x1ef   :  { %v153_v16 = vmul.f32 %v152_v15, %v152_v15 }
 0x1f1   :  { %154 = vadd.xlane.f32.xlu1 %v153_v16 }
 0x27a   :  { %v155_v25 = vpop.xlane.xlu1 %154 }
 0x27b   :  { %v156_v26 = vmul.f32 0.0078125, %v155_v25 }
 0x27d   :  { %v157_v27 = vadd.f32 1e-05, %v156_v26 }
 0x27f   :  { %385 = vrsqrt.f32 %v157_v27 }
 0x28c   :  { %v386_v28 = vpop.eup %385 }
 0x28d   :  { %v159_v30 = vmul.f32 %v386_v28, %v152_v15 }
 0x28f   :  { %v167_v32 = vmul.f32 %v315_v29, %v159_v30 }
 0x291   :  { %v175_v33 = vadd.f32 %v316_v31, %v167_v32 }
 0x293   :  { %v317_v34 = vmul.f32 -1.442695, %v175_v33 }
 0x295   :  { %387 = vpow2.f32 %v317_v34 }
 0x2a2   :  { %v388_v35 = vpop.eup %387 }
 0x2a3   :  { %v179_v36 = vadd.f32 1.0, %v388_v35 }
 0x2a5   :  { %389 = vrcp.f32 %v179_v36 }
 0x2b2   :  { %v390_v37 = vpop.eup %389 }
 0x2b3   :  { %v182_v38 = vmul.f32 %v390_v37, %v175_v33 }
 0x2b5   :  { %v183_v39 = vpack.c.bf16 %v182_v38, %v182_v38 }
 0x2b7   :  { %363 = vmatmul.mubr.bf16.vlgmr.msra.gmra.mxu1 %v183_v39 }
 0x377   :  { %v289_v41 = vpop.f32.mrf.mxu1 }
 0x378   :  { %v290_v42 = vadd.f32 %v318_v40, %v289_v41 }
 0x379   :  { %v364_v43 = vpop.f32.mrf.mxu1 }
 0x37a   :  { %295 = vst [vmem:[#allocation7] sm:$0xff] %v290_v42 }
 0x37b   :  { %v292_v44 = vpop.f32.mrf.mxu1 }
 0x37c   :  { %442 = shalt.err (!%p439_p0)
}
 0x37d   :  { %305 = dma.vmem_to_hbm [thread:$0]  %s303_s21, 128, %s538_s7, [#allocation4]   ;;  %v365_v45 = vpop.f32.mrf.mxu1 }
 0x37e   :  { %455 = dma.done.wait [#allocation4], 128  }
 0x37f   :  { %456 = vsyncadd [#allocation4], 4294967168 }
 0x380   :  { %309 = vsyncpa [#allocation3], 1 }
 0x381   :  { %310 = vsyncpa [#allocation6], 1 }
 0x382   :  { %311 = vsyncpa [#allocation4], 1 }

</bundles_post_ra>
